<compile_context>
chip_gen: v5e
topology: v5e:2x2
jax: 0.10.0
libtpu: 0.0.40
codegen_flags: <defaults>
</compile_context>

<pallas_src>
import functools

import jax
import jax.numpy as jnp
from jax.experimental import pallas as pl
from jax.experimental.pallas import tpu as pltpu


def _geometric_combine_kernel(sm_ref, x_ref, o_ref, *, K, H):
    # sm_ref: (K, H) f32 softmaxed geometric weights (grid-invariant).
    # x_ref : (tile_n, K*H)  hops flattened into the lane axis.
    # o_ref : (tile_n, H)
    acc = x_ref[:, 0:H].astype(jnp.float32) * sm_ref[0:1, :]
    for k in range(1, K):  # static short unroll: K-1 VPU FMAs, no XLU reduce
        acc = acc + x_ref[:, k * H:(k + 1) * H].astype(jnp.float32) * sm_ref[k:k + 1, :]
    o_ref[...] = acc.astype(o_ref.dtype)


def _round_up(n, m):
    return ((n + m - 1) // m) * m


def geometric_combine(x, alphas, *, tile_n=512):
    """x: (N, K, H) float, alphas: (H,) float -> (N, H).

    Matches GeometricCombine.forward: softmax over the hop axis of
    sigmoid(alpha) * (1 - sigmoid(alpha))**i, then weighted sum over hops.
    """
    N, K, H = x.shape
    out_dtype = x.dtype if jnp.issubdtype(x.dtype, jnp.floating) else jnp.float32

    # ---- grid-invariant weights, computed once on the wrapper side ----
    a = jax.nn.sigmoid(alphas.astype(jnp.float32))                       # (H,)
    thetas = jnp.stack([a * (1.0 - a) ** i for i in range(K)], axis=0)   # (K, H)
    sm = jax.nn.softmax(thetas, axis=0).astype(jnp.float32)              # (K, H)

    # ---- flatten hops into the lane axis; pad rows to the tile size ----
    x_flat = x.reshape(N, K * H)
    tile_n_eff = min(tile_n, _round_up(N, 8))       # sublane-aligned, no tiny waste
    grid_n = pl.cdiv(N, tile_n_eff)
    n_pad = grid_n * tile_n_eff
    if n_pad != N:
        x_flat = jnp.pad(x_flat, ((0, n_pad - N), (0, 0)))

    kernel = functools.partial(_geometric_combine_kernel, K=K, H=H)
    out = pl.pallas_call(
        kernel,
        out_shape=jax.ShapeDtypeStruct((n_pad, H), out_dtype),
        grid_spec=pltpu.PrefetchScalarGridSpec(
            num_scalar_prefetch=0,
            grid=(grid_n,),
            in_specs=[
                pl.BlockSpec((K, H), lambda i: (0, 0)),             # sm (broadcast)
                pl.BlockSpec((tile_n_eff, K * H), lambda i: (i, 0)),  # x row tile
            ],
            out_specs=pl.BlockSpec((tile_n_eff, H), lambda i: (i, 0)),
        ),
        compiler_params=pltpu.CompilerParams(
            dimension_semantics=("parallel",),
        ),
    )(sm, x_flat)
    return out[:N]


def _reference(x, alphas):
    a = jax.nn.sigmoid(alphas)                                           # (H,)
    K = x.shape[-2]
    thetas = jnp.stack([a * (1.0 - a) ** i for i in range(K)], axis=0)   # (K, H)
    thetas = jax.nn.softmax(thetas, axis=0)
    return jnp.sum(x * thetas[None, :, :], axis=-2)


if __name__ == "__main__":
    key = jax.random.PRNGKey(0)
    N, K, H = 16, 4, 128
    kx, ka = jax.random.split(key)
    x = jax.random.normal(kx, (N, K, H), dtype=jnp.float32)
    # Module __init__ sets alphas = zeros(hidden_size); perturb deterministically
    # so the geometric weighting is non-trivial.
    alphas = 0.1 * jax.random.normal(ka, (H,), dtype=jnp.float32)

    out = geometric_combine(x, alphas)
    out = jax.block_until_ready(out)

    ref = _reference(x, alphas)
    assert out.shape == (N, H)
    assert jnp.allclose(out, ref, atol=1e-5, rtol=1e-5), "mismatch vs reference"

    # Also exercise the multi-tile / padded-tail path at a larger N.
    N2 = 1300  # not a multiple of the 512-row tile -> padded, grid of 3
    x2 = jax.random.normal(jax.random.PRNGKey(1), (N2, K, H), dtype=jnp.float32)
    out2 = jax.block_until_ready(geometric_combine(x2, alphas))
    ref2 = _reference(x2, alphas)
    assert out2.shape == (N2, H)
    assert jnp.allclose(out2, ref2, atol=1e-5, rtol=1e-5), "mismatch vs reference (large N)"

    print("KERNEL_OK")
</pallas_src>

<mosaic_0001>
module attributes {stable_mosaic.version = 11 : i64} {
  func.func @_geometric_combine_kernel(%arg0: i32, %arg1: memref<4x128xf32, #tpu.memory_space<vmem>>, %arg2: memref<16x512xf32, #tpu.memory_space<vmem>>, %arg3: memref<16x128xf32, #tpu.memory_space<vmem>>) attributes {dimension_semantics = [#tpu.dimension_semantics<parallel>], iteration_bounds = array<i64: 1>, scalar_prefetch = 0 : i64, scratch_operands = 0 : i64, tpu.core_type = #tpu.core_type<tc>, window_params = [{pipeline_mode = #tpu.pipeline_mode<synchronous>, transform_indices = @transform_0, window_bounds = array<i64: 4, 128>}, {transform_indices = @transform_1, window_bounds = array<i64: 16, 512>}, {transform_indices = @transform_2, window_bounds = array<i64: 16, 128>}]} {
    %c0 = arith.constant 0 : index
    %c0_0 = arith.constant 0 : index
    %0 = vector.load %arg2[%c0, %c0_0] : memref<16x512xf32, #tpu.memory_space<vmem>>, vector<16x128xf32>
    %c0_1 = arith.constant 0 : index
    %c0_2 = arith.constant 0 : index
    %1 = vector.load %arg1[%c0_1, %c0_2] : memref<4x128xf32, #tpu.memory_space<vmem>>, vector<1x128xf32>
    %2 = vector.broadcast %1 : vector<1x128xf32> to vector<16x128xf32>
    %3 = arith.mulf %0, %2 : vector<16x128xf32>
    %c0_3 = arith.constant 0 : index
    %c128 = arith.constant 128 : index
    %4 = vector.load %arg2[%c0_3, %c128] : memref<16x512xf32, #tpu.memory_space<vmem>>, vector<16x128xf32>
    %c1 = arith.constant 1 : index
    %c0_4 = arith.constant 0 : index
    %5 = vector.load %arg1[%c1, %c0_4] : memref<4x128xf32, #tpu.memory_space<vmem>>, vector<1x128xf32>
    %6 = vector.broadcast %5 : vector<1x128xf32> to vector<16x128xf32>
    %7 = arith.mulf %4, %6 : vector<16x128xf32>
    %8 = arith.addf %3, %7 : vector<16x128xf32>
    %c0_5 = arith.constant 0 : index
    %c256 = arith.constant 256 : index
    %9 = vector.load %arg2[%c0_5, %c256] : memref<16x512xf32, #tpu.memory_space<vmem>>, vector<16x128xf32>
    %c2 = arith.constant 2 : index
    %c0_6 = arith.constant 0 : index
    %10 = vector.load %arg1[%c2, %c0_6] : memref<4x128xf32, #tpu.memory_space<vmem>>, vector<1x128xf32>
    %11 = vector.broadcast %10 : vector<1x128xf32> to vector<16x128xf32>
    %12 = arith.mulf %9, %11 : vector<16x128xf32>
    %13 = arith.addf %8, %12 : vector<16x128xf32>
    %c0_7 = arith.constant 0 : index
    %c384 = arith.constant 384 : index
    %14 = vector.load %arg2[%c0_7, %c384] : memref<16x512xf32, #tpu.memory_space<vmem>>, vector<16x128xf32>
    %c3 = arith.constant 3 : index
    %c0_8 = arith.constant 0 : index
    %15 = vector.load %arg1[%c3, %c0_8] : memref<4x128xf32, #tpu.memory_space<vmem>>, vector<1x128xf32>
    %16 = vector.broadcast %15 : vector<1x128xf32> to vector<16x128xf32>
    %17 = arith.mulf %14, %16 : vector<16x128xf32>
    %18 = arith.addf %13, %17 : vector<16x128xf32>
    %c0_9 = arith.constant 0 : index
    %c0_10 = arith.constant 0 : index
    %19 = vector.load %arg3[%c0_9, %c0_10] : memref<16x128xf32, #tpu.memory_space<vmem>>, vector<16x128xf32>
    tpu.vector_store %arg3[%c0_9, %c0_10], %18 {strides = array<i32>} : memref<16x128xf32, #tpu.memory_space<vmem>>, vector<16x128xf32>,
    return
  }
  func.func @transform_0(%arg0: i32) -> (i32, i32) {
    %c0_i32 = arith.constant 0 : i32
    %c0_i32_0 = arith.constant 0 : i32
    %c0_i32_1 = arith.constant 0 : i32
    return %c0_i32, %c0_i32_0 : i32, i32
  }
  func.func @transform_1(%arg0: i32) -> (i32, i32) {
    %c0_i32 = arith.constant 0 : i32
    %c0_i32_0 = arith.constant 0 : i32
    return %arg0, %c0_i32 : i32, i32
  }
  func.func @transform_2(%arg0: i32) -> (i32, i32) {
    %c0_i32 = arith.constant 0 : i32
    %c0_i32_0 = arith.constant 0 : i32
    return %arg0, %c0_i32 : i32, i32
  }
}

</mosaic_0001>

<bundles_post_ra>
// kernel: tpu_custom_call.1
= control target key start
LH: loop header
LB: loop body
LE: loop exit
PB: predicated region body
PF: predicated region fallthrough
CT: control target
= control target key end

     0   :  { %7 = vsyncpa [#allocation3], 0  ;;  %s214_s0 = inlined_call_operand.hbm [shape: f32[4,128], index: 0, kind: input, shape index: {}]   ;;  %s215_s1 = inlined_call_operand.hbm [shape: f32[16,512], index: 1, kind: input, shape index: {}]   ;;  %s216_s2 = inlined_call_operand.hbm [shape: f32[16,128], index: 2, kind: output, shape index: {}]  }
   0x1   :  { %8 = vsyncpa [#allocation6], 0 }
   0x2   :  { %9 = vsyncpa [#allocation4], 0  ;;  %s15_s11 = sshll.u32 %s214_s0, 4  ;;  %s183_s12 = smov [#allocation2]   ;;  %s16_s11 = int_to_ptr.hbm [resolvable:$true] %s15_s11 }
   0x3   :  { %s17_s13 = sshll.u32 %s183_s12, 4  ;;  %s25_s16 = sshll.u32 %s215_s1, 4  ;;  %s18_s13 = int_to_ptr.vmem [resolvable:$true] %s17_s13  ;;  %s26_s16 = int_to_ptr.hbm [resolvable:$true] %s25_s16 }
   0x4   :  { %20 = dma.hbm_to_vmem [thread:$0]  %s16_s11, 64, %s18_s13, [#allocation3]  }
   0x5   :  { %s184_s17 = smov [#allocation5]   ;;  %s185_s19 = smov 512  }
   0x6   :  { %s27_s18 = sshll.u32 %s184_s17, 4  ;;  %s186_s20 = smov 32   ;;  %s28_s18 = int_to_ptr.vmem [resolvable:$true] %s27_s18 }
   0x7   :  { %33 = dma.hbm_to_vmem [thread:$0]  %s26_s16, 1024, %s28_s18, [#allocation6], %s185_s19, %s185_s19, %s186_s20  }
   0x8   :  { %177 = dma.done.wait [#allocation3], 64  }
   0x9   :  { %178 = vsyncadd [#allocation3], 4294967232 }
   0xa   :  { %179 = dma.done.wait [#allocation6], 1024  }
   0xb   :  { %180 = vsyncadd [#allocation6], 4294966272  ;;  %v42_v0 = vld [vmem:[#allocation5] sm:$0xff]  ;;  %v101_v1 = vld [vmem:[#allocation2] ss:$0 sm:$0xff]  ;;  %s187_s0 = smov [#allocation7]  }
   0xc   :  { %v48_v2 = vld [vmem:[#allocation5 + $0x8] sm:$0xff]  ;;  %v102_v3 = vld [vmem:[#allocation2 + $0x1] ss:$0 sm:$0xff]  ;;  %v46_v4 = vmul.f32 %v101_v1, %v42_v0  ;;  %v56_v5 = vld [vmem:[#allocation5 + $0x10] sm:$0xff]  ;;  %s78_s1 = sshll.u32 %s187_s0, 4  ;;  %s80_s23 = sshll.u32 %s216_s2, 4  ;;  %s79_s1 = int_to_ptr.vmem [resolvable:$true] %s78_s1  ;;  %s81_s23 = int_to_ptr.hbm [resolvable:$true] %s80_s23 }
   0xd   :  { %v103_v6 = vld [vmem:[#allocation2 + $0x2] ss:$0 sm:$0xff]  ;;  %v52_v7 = vmul.f32 %v102_v3, %v48_v2  ;;  %v104_v9 = vld [vmem:[#allocation2 + $0x3] ss:$0 sm:$0xff]  ;;  %v43_v11 = vld [vmem:[#allocation5 + $0x20] sm:$0xff]  ;;  %s188_s24 = smov 128  }
   0xe   :  { %v64_v8 = vld [vmem:[#allocation5 + $0x18] sm:$0xff]  ;;  %v60_v10 = vmul.f32 %v103_v6, %v56_v5  ;;  %v49_v12 = vld [vmem:[#allocation5 + $0x28] sm:$0xff]  ;;  %v57_v13 = vld [vmem:[#allocation5 + $0x30] sm:$0xff]  ;;  %v47_v16 = vmul.f32 %v101_v1, %v43_v11  ;;  %s189_s25 = smov 8  }
   0xf   :  { %v54_v14 = vadd.f32 %v52_v7, %v46_v4  ;;  %v68_v15 = vmul.f32 %v104_v9, %v64_v8  ;;  %v53_v17 = vmul.f32 %v102_v3, %v49_v12  ;;  %v65_v18 = vld [vmem:[#allocation5 + $0x38] sm:$0xff]  ;;  %v61_v19 = vmul.f32 %v103_v6, %v57_v13 }
  0x10   :  { %v69_v22 = vmul.f32 %v104_v9, %v65_v18 }
  0x11   :  { %v62_v20 = vadd.f32 %v60_v10, %v54_v14  ;;  %v55_v21 = vadd.f32 %v53_v17, %v47_v16 }
  0x13   :  { %v70_v23 = vadd.f32 %v68_v15, %v62_v20  ;;  %v63_v24 = vadd.f32 %v61_v19, %v55_v21 }
  0x15   :  { %72 = vst [vmem:[#allocation7] sm:$0xff] %v70_v23  ;;  %v71_v25 = vadd.f32 %v69_v22, %v63_v24 }
  0x17   :  { %73 = vst [vmem:[#allocation7 + $0x8] sm:$0xff] %v71_v25 }
  0x18   :  { %86 = dma.vmem_to_hbm [thread:$0]  %s79_s1, 256, %s81_s23, [#allocation4], %s188_s24, %s188_s24, %s189_s25  }
  0x19   :  { %181 = dma.done.wait [#allocation4], 256  }
  0x1a   :  { %182 = vsyncadd [#allocation4], 4294967040 }
  0x1b   :  { %91 = vsyncpa [#allocation3], 1 }
  0x1c   :  { %92 = vsyncpa [#allocation6], 1 }
  0x1d   :  { %93 = vsyncpa [#allocation4], 1 }

</bundles_post_ra>
